<compile_context>
chip_gen: v7x
topology: tpu7x:2x2x1
jax: 0.10.0
libtpu: 0.0.40
codegen_flags: <defaults>
</compile_context>

<pallas_src>
import jax
import jax.numpy as jnp
import numpy as np
from jax.experimental import pallas as pl
from jax.experimental.pallas import tpu as pltpu

EPS = 1e-5  # PyTorch GroupNorm default


def _adapter_kernel(x_ref, w1_ref, c1_ref, p1d_ref, p1u_ref,
                    w2_ref, c2_ref, p2d_ref, p2u_ref, o_ref):
    nb, hw, cin = x_ref.shape
    hd = w1_ref.shape[1]
    fhw = float(hw)
    inv_hw = 1.0 / fhw

    # ---- Conv2d(in, hidden, 1): bf16 MXU matmul, fp32 accumulate.
    # Bias is NOT added to the full tensor; it is folded into the GN shift below.
    x = x_ref[...]                                           # (nb, hw, cin)
    h = jnp.dot(x.reshape(nb * hw, cin).astype(jnp.bfloat16), w1_ref[...],
                preferred_element_type=jnp.float32).reshape(nb, hw, hd)

    c1 = c1_ref[...]                                         # (3, hd) fp32
    b1, g1, be1 = c1[0:1], c1[1:2], c1[2:3]                  # bias, gamma, beta

    # ---- GroupNorm(ng1, hidden): one-pass stats, bias folded analytically.
    s = jnp.sum(h, axis=1)                                   # (nb, hd)
    ss = jnp.sum(h * h, axis=1)                              # (nb, hd)
    s_b = s + fhw * b1                                       # stats of (h + b1)
    ss_b = ss + 2.0 * b1 * s + fhw * (b1 * b1)
    stats = jnp.concatenate([s_b, ss_b], axis=0)             # (2*nb, hd)
    pooled = jnp.dot(
        jnp.dot(stats, p1d_ref[...], preferred_element_type=jnp.float32),
        p1u_ref[...], preferred_element_type=jnp.float32) * inv_hw
    mu, m2 = pooled[:nb], pooled[nb:]                        # group mean / E[x^2]
    var = jnp.maximum(m2 - mu * mu, 0.0)                     # clamp fp32 cancellation
    scale = jax.lax.rsqrt(var + EPS) * g1                    # folded affine
    shift = be1 + (b1 - mu) * scale                          # conv bias folded here
    hn = jnp.maximum(h * scale[:, None, :] + shift[:, None, :], 0.0)

    # ---- Conv2d(hidden, in, 1).
    y = jnp.dot(hn.reshape(nb * hw, hd).astype(jnp.bfloat16), w2_ref[...],
                preferred_element_type=jnp.float32).reshape(nb, hw, cin)

    c2 = c2_ref[...]                                         # (3, cin)
    b2, g2, be2 = c2[0:1], c2[1:2], c2[2:3]

    # ---- GroupNorm(ng2, in).
    s2 = jnp.sum(y, axis=1)
    ss2 = jnp.sum(y * y, axis=1)
    s2_b = s2 + fhw * b2
    ss2_b = ss2 + 2.0 * b2 * s2 + fhw * (b2 * b2)
    stats2 = jnp.concatenate([s2_b, ss2_b], axis=0)
    pooled2 = jnp.dot(
        jnp.dot(stats2, p2d_ref[...], preferred_element_type=jnp.float32),
        p2u_ref[...], preferred_element_type=jnp.float32) * inv_hw
    mu2, m22 = pooled2[:nb], pooled2[nb:]
    var2 = jnp.maximum(m22 - mu2 * mu2, 0.0)
    scale2 = jax.lax.rsqrt(var2 + EPS) * g2
    shift2 = be2 + (b2 - mu2) * scale2

    # ---- residual + ReLU; re-read x from VMEM (no long-lived fp32 copy).
    o_ref[...] = jnp.maximum(
        x_ref[...].astype(jnp.float32)
        + y * scale2[:, None, :] + shift2[:, None, :], 0.0).astype(o_ref.dtype)


def _vmem_capacity_bytes():
    """Per-core VMEM capacity; conservative 64 MiB (v7x) fallback."""
    try:
        return int(pltpu.get_tpu_info().vmem_capacity_bytes)
    except Exception:
        return 64 * 1024 * 1024


def _pick_batch_tile(n, hw, c, hd, x_itemsize, const_bytes, vmem_capacity):
    """Largest divisor of n whose per-step footprint fits the VMEM budget,
    capped so the grid stays >= 4 steps (pipelining + v7x megacore split)."""
    # Leave headroom for compiler scratch; constants counted twice in case the
    # single-buffer pipeline_mode fallback is taken.
    budget = int(vmem_capacity * 0.6) - 2 * const_bytes
    per_sample = hw * (
        2 * 2 * x_itemsize * c   # x + out blocks, double-buffered by the pipeline
        + 2 * 4 * hd             # h, hn fp32 intermediates
        + 2 * (c + hd)           # bf16 operand copies fed to the MXU
        + 2 * 4 * c              # y fp32 + fp32 residual upcast of x
    )
    nb = max(1, min(n, budget // max(per_sample, 1)))
    nb = min(nb, max(1, n // 4))   # >= 4 grid steps (>= 2 per TensorCore on v7x)
    while n % nb:
        nb -= 1
    # TODO(synk): if even nb == 1 exceeds VMEM (large FPN maps on v7x's 64 MiB),
    # add an HW-tiled multi-pass GroupNorm path (accumulate s/ss per HW tile in
    # scratch, pl.when-finalize, re-stream for scale/shift + conv2 + residual).
    return nb


def _const_spec(shape):
    """Constant operand: block index never changes -> single pipeline buffer."""
    idx_map = lambda i: (0, 0)
    try:
        return pl.BlockSpec(shape, idx_map, pipeline_mode=pl.Buffered(1))
    except Exception:
        return pl.BlockSpec(shape, idx_map)


def domain_adapter_pallas(x_flat, params):
    """DomainAdapter on channels-last features.

    x_flat: (N, HW, C); output has the same shape and dtype.  Pass bf16 features
    for best performance (the kernel is HBM-bandwidth-bound); GroupNorm math and
    matmul accumulation stay in fp32 regardless of the I/O dtype.
    """
    n, hw, c = x_flat.shape
    hd = params["w1"].shape[1]
    ng1 = params["p1d"].shape[1]
    ng2 = params["p2d"].shape[1]

    x_itemsize = jnp.dtype(x_flat.dtype).itemsize
    const_bytes = int(
        params["w1"].size * params["w1"].dtype.itemsize
        + params["w2"].size * params["w2"].dtype.itemsize
        + 4 * (params["c1"].size + params["c2"].size + params["p1d"].size
               + params["p1u"].size + params["p2d"].size + params["p2u"].size))
    vmem_cap = _vmem_capacity_bytes()
    nb = _pick_batch_tile(n, hw, c, hd, x_itemsize, const_bytes, vmem_cap)
    vmem_limit = min(int(vmem_cap * 0.75), 100 * 1024 * 1024)

    return pl.pallas_call(
        _adapter_kernel,
        out_shape=jax.ShapeDtypeStruct((n, hw, c), x_flat.dtype),
        grid_spec=pltpu.PrefetchScalarGridSpec(
            num_scalar_prefetch=0,
            grid=(n // nb,),
            in_specs=[
                pl.BlockSpec((nb, hw, c), lambda i: (i, 0, 0)),   # x
                _const_spec((c, hd)),      # w1 (bf16)
                _const_spec((3, hd)),      # [b1; gn1_w; gn1_b]
                _const_spec((hd, ng1)),    # group down-proj 1
                _const_spec((ng1, hd)),    # group up-proj 1
                _const_spec((hd, c)),      # w2 (bf16)
                _const_spec((3, c)),       # [b2; gn2_w; gn2_b]
                _const_spec((c, ng2)),     # group down-proj 2
                _const_spec((ng2, c)),     # group up-proj 2
            ],
            out_specs=pl.BlockSpec((nb, hw, c), lambda i: (i, 0, 0)),
        ),
        compiler_params=pltpu.CompilerParams(
            dimension_semantics=("parallel",),   # batch tiles split across TCs
            vmem_limit_bytes=vmem_limit,         # generation-aware scoped limit
        ),
    )(x_flat, params["w1"], params["c1"], params["p1d"], params["p1u"],
      params["w2"], params["c2"], params["p2d"], params["p2u"])


def _group_pool_matrices(num_channels, num_groups):
    """Low-rank GroupNorm pooling factors (instead of a dense CxC agg matrix)."""
    gsize = num_channels // num_groups
    gid = np.arange(num_channels) // gsize
    onehot = (gid[:, None] == np.arange(num_groups)[None, :]).astype(np.float32)
    p_down = jnp.asarray(onehot / float(gsize))   # (C, ng): channel sums -> group mean (x 1/HW in kernel)
    p_up = jnp.asarray(onehot.T)                  # (ng, C): broadcast group value back to channels
    return p_down, p_up


def init_domain_adapter_params(key, in_channels, reduction=4):
    """Deterministic synthetic parameters matching the PyTorch module shapes.

    Note (v6e/v7x): hidden = max(C/reduction, 16) underfills the 256-wide MXU for
    conv1's N dim / conv2's K dim; harmless while memory-bound, revisit if the
    kernel ever becomes MXU-bound (e.g. round hidden to 128 if quality allows).
    """
    hidden = max(in_channels // reduction, 16)
    ng1 = min(32, hidden)
    ng2 = min(32, in_channels)
    k = jax.random.split(key, 8)
    s1 = 1.0 / np.sqrt(in_channels)
    s2 = 1.0 / np.sqrt(hidden)
    p1d, p1u = _group_pool_matrices(hidden, ng1)
    p2d, p2u = _group_pool_matrices(in_channels, ng2)
    return {
        # Conv2d(in, hidden, 1) weight (hidden, in, 1, 1) stored transposed (in, hidden), bf16 for the MXU
        "w1": (jax.random.normal(k[0], (in_channels, hidden), jnp.float32) * s1
               ).astype(jnp.bfloat16),
        # rows: [conv bias; GN weight; GN bias] (fp32)
        "c1": jnp.concatenate([
            jax.random.normal(k[1], (1, hidden), jnp.float32) * s1,
            1.0 + 0.1 * jax.random.normal(k[2], (1, hidden), jnp.float32),
            0.1 * jax.random.normal(k[3], (1, hidden), jnp.float32),
        ], axis=0),
        "p1d": p1d, "p1u": p1u,
        "w2": (jax.random.normal(k[4], (hidden, in_channels), jnp.float32) * s2
               ).astype(jnp.bfloat16),
        "c2": jnp.concatenate([
            jax.random.normal(k[5], (1, in_channels), jnp.float32) * s2,
            1.0 + 0.1 * jax.random.normal(k[6], (1, in_channels), jnp.float32),
            0.1 * jax.random.normal(k[7], (1, in_channels), jnp.float32),
        ], axis=0),
        "p2d": p2d, "p2u": p2u,
    }


# --- pure-JAX adapter (used both as the C<128 dispatch path and as reference) ---
def _reference_adapter_nhwc(x_nhwc, p, *, mirror_bf16):
    n, hgt, wid, c = x_nhwc.shape
    x = x_nhwc.reshape(n, hgt * wid, c).astype(jnp.float32)
    ng1 = p["p1d"].shape[1]
    ng2 = p["p2d"].shape[1]

    def mm(a, w):
        if mirror_bf16:   # mirror the kernel's bf16-matmul / fp32-accumulate policy
            return jnp.dot(a.astype(jnp.bfloat16), w.astype(jnp.bfloat16),
                           preferred_element_type=jnp.float32)
        return jnp.dot(a, w.astype(jnp.float32), preferred_element_type=jnp.float32)

    def gn(v, ng, gamma, beta):
        nn, hw, ch = v.shape
        g = v.reshape(nn, hw, ng, ch // ng)
        mu = jnp.mean(g, axis=(1, 3), keepdims=True)
        var = jnp.mean(jnp.square(g - mu), axis=(1, 3), keepdims=True)
        out = (g - mu) / jnp.sqrt(var + EPS)
        return out.reshape(nn, hw, ch) * gamma + beta

    h = mm(x, p["w1"]) + p["c1"][0:1]
    h = jnp.maximum(gn(h, ng1, p["c1"][1:2], p["c1"][2:3]), 0.0)
    y = mm(h, p["w2"]) + p["c2"][0:1]
    y = gn(y, ng2, p["c2"][1:2], p["c2"][2:3])
    out = jnp.maximum(x + y, 0.0)
    return out.reshape(n, hgt, wid, c)


def _domain_adapter_xla(x_nhwc, p):
    """Plain-XLA fp32 path (used for C < 128 levels: masked vst.msk avoidance)."""
    return _reference_adapter_nhwc(x_nhwc, p, mirror_bf16=False)


def _reference_adapter_nchw(feat_nchw, p, *, mirror_bf16):
    out = _reference_adapter_nhwc(jnp.transpose(feat_nchw, (0, 2, 3, 1)), p,
                                  mirror_bf16=mirror_bf16)
    return jnp.transpose(out, (0, 3, 1, 2))


def adapter_module_forward_nhwc(features_nhwc, all_params, *, min_pallas_channels=128):
    """Preferred entry point: dict[name] -> (N, H, W, C). No HBM transposes.

    Pass bf16 feature maps for best performance (halves HBM read+write bytes of a
    memory-bound kernel).  Levels with C < min_pallas_channels are dispatched to
    plain XLA: their last-dim-< 128 output lanes would force masked partial
    stores in the Pallas path.
    """
    adapted = {}
    for name, feat in features_nhwc.items():
        if name not in all_params:
            adapted[name] = feat
            continue
        p = all_params[name]
        n, h, w, c = feat.shape
        if c < min_pallas_channels:
            adapted[name] = _domain_adapter_xla(feat, p).astype(feat.dtype)
            continue
        y = domain_adapter_pallas(feat.reshape(n, h * w, c), p)
        adapted[name] = y.reshape(n, h, w, c)
    return adapted


def adapter_module_forward(features_nchw, all_params):
    """AdapterModule.forward with the PyTorch NCHW convention (compat wrapper).

    For best performance keep features NHWC (and bf16) end-to-end and call
    adapter_module_forward_nhwc directly: each transpose here is a full
    read+write of the feature map in HBM.
    """
    nhwc = {n: jnp.transpose(f, (0, 2, 3, 1)) for n, f in features_nchw.items()}
    out = adapter_module_forward_nhwc(nhwc, all_params)
    return {n: jnp.transpose(f, (0, 3, 1, 2)) for n, f in out.items()}


if __name__ == "__main__":
    key = jax.random.PRNGKey(0)

    # Small synthetic backbone feature pyramid (batch=2), PyTorch NCHW convention.
    feature_dims = {"layer1": 32, "layer2": 64, "layer3": 128, "layer4": 256}
    spatial = {"layer1": 16, "layer2": 8, "layer3": 4, "layer4": 2}
    batch = 2

    keys = jax.random.split(key, 2 * len(feature_dims))
    features = {}
    all_params = {}
    for i, name in enumerate(feature_dims):
        c, s = feature_dims[name], spatial[name]
        features[name] = jax.random.normal(keys[2 * i], (batch, c, s, s), jnp.float32)
        all_params[name] = init_domain_adapter_params(keys[2 * i + 1], c)

    # 1) Full module forward (NCHW compat; C<128 levels dispatched to XLA).
    out = adapter_module_forward(features, all_params)
    out = jax.tree_util.tree_map(jax.block_until_ready, out)
    for name in feature_dims:
        got = np.asarray(out[name])
        ref_f32 = np.asarray(_reference_adapter_nchw(
            features[name], all_params[name], mirror_bf16=False))
        if feature_dims[name] >= 128:   # Pallas path: bf16 MXU matmul policy
            ref_mirror = np.asarray(_reference_adapter_nchw(
                features[name], all_params[name], mirror_bf16=True))
            np.testing.assert_allclose(got, ref_mirror, rtol=5e-3, atol=5e-3)
            np.testing.assert_allclose(got, ref_f32, rtol=1e-1, atol=1e-1)
        else:                            # XLA path: fp32 convs, near-exact
            np.testing.assert_allclose(got, ref_f32, rtol=1e-4, atol=1e-4)

    # 2) Pallas path forced on a C<128 level (masked-store path is still correct).
    name = "layer1"
    feat = jnp.transpose(features[name], (0, 2, 3, 1))
    n, h, w, c = feat.shape
    got_small = domain_adapter_pallas(feat.reshape(n, h * w, c), all_params[name])
    got_small = np.asarray(jax.block_until_ready(got_small)).reshape(n, h, w, c)
    ref_small = np.asarray(_reference_adapter_nhwc(feat, all_params[name], mirror_bf16=True))
    np.testing.assert_allclose(got_small, ref_small, rtol=5e-3, atol=5e-3)

    # 3) bf16 feature-I/O path (recommended HBM format: halves read+write bytes).
    name = "layer4"
    feat16 = jnp.transpose(features[name], (0, 2, 3, 1)).astype(jnp.bfloat16)
    out16 = adapter_module_forward_nhwc({name: feat16}, all_params)[name]
    out16 = jax.block_until_ready(out16)
    assert out16.dtype == jnp.bfloat16
    ref16 = np.asarray(_reference_adapter_nhwc(feat16, all_params[name], mirror_bf16=True))
    np.testing.assert_allclose(np.asarray(out16, dtype=np.float32), ref16,
                               rtol=2e-2, atol=5e-2)

    print("KERNEL_OK")
</pallas_src>

<mosaic_0001>
module attributes {stable_mosaic.version = 11 : i64} {
  func.func @_adapter_kernel(%arg0: i32, %arg1: memref<1x16x128xf32, #tpu.memory_space<vmem>>, %arg2: memref<128x32xbf16, #tpu.memory_space<vmem>>, %arg3: memref<3x32xf32, #tpu.memory_space<vmem>>, %arg4: memref<32x32xf32, #tpu.memory_space<vmem>>, %arg5: memref<32x32xf32, #tpu.memory_space<vmem>>, %arg6: memref<32x128xbf16, #tpu.memory_space<vmem>>, %arg7: memref<3x128xf32, #tpu.memory_space<vmem>>, %arg8: memref<128x32xf32, #tpu.memory_space<vmem>>, %arg9: memref<32x128xf32, #tpu.memory_space<vmem>>, %arg10: memref<1x16x128xf32, #tpu.memory_space<vmem>>) attributes {dimension_semantics = [#tpu.dimension_semantics<parallel>], iteration_bounds = array<i64: 2>, scalar_prefetch = 0 : i64, scratch_operands = 0 : i64, tpu.core_type = #tpu.core_type<tc>, window_params = [{transform_indices = @transform_0, window_bounds = array<i64: 1, 16, 128>}, {pipeline_mode = #tpu.pipeline_mode<synchronous>, transform_indices = @transform_1, window_bounds = array<i64: 128, 32>}, {pipeline_mode = #tpu.pipeline_mode<synchronous>, transform_indices = @transform_2, window_bounds = array<i64: 3, 32>}, {pipeline_mode = #tpu.pipeline_mode<synchronous>, transform_indices = @transform_3, window_bounds = array<i64: 32, 32>}, {pipeline_mode = #tpu.pipeline_mode<synchronous>, transform_indices = @transform_4, window_bounds = array<i64: 32, 32>}, {pipeline_mode = #tpu.pipeline_mode<synchronous>, transform_indices = @transform_5, window_bounds = array<i64: 32, 128>}, {pipeline_mode = #tpu.pipeline_mode<synchronous>, transform_indices = @transform_6, window_bounds = array<i64: 3, 128>}, {pipeline_mode = #tpu.pipeline_mode<synchronous>, transform_indices = @transform_7, window_bounds = array<i64: 128, 32>}, {pipeline_mode = #tpu.pipeline_mode<synchronous>, transform_indices = @transform_8, window_bounds = array<i64: 32, 128>}, {transform_indices = @transform_9, window_bounds = array<i64: 1, 16, 128>}]} {
    %c0 = arith.constant 0 : index
    %c0_0 = arith.constant 0 : index
    %c0_1 = arith.constant 0 : index
    %0 = vector.load %arg1[%c0, %c0_0, %c0_1] : memref<1x16x128xf32, #tpu.memory_space<vmem>>, vector<1x16x128xf32>
    %1 = vector.shape_cast %0 : vector<1x16x128xf32> to vector<16x128xf32>
    %2 = arith.truncf %1 : vector<16x128xf32> to vector<16x128xbf16>
    %c0_2 = arith.constant 0 : index
    %c0_3 = arith.constant 0 : index
    %3 = vector.load %arg2[%c0_2, %c0_3] : memref<128x32xbf16, #tpu.memory_space<vmem>>, vector<128x32xbf16>
    %cst = arith.constant dense<0.000000e+00> : vector<16x32xf32>
    %4 = tpu.matmul %2, %3, %cst {dimension_numbers = #tpu.dot_dimension_numbers<[1], [0], [0], [1], [0, 0, 1, 1], [], []>} : vector<16x128xbf16>, vector<128x32xbf16>, vector<16x32xf32> -> vector<16x32xf32>
    %5 = vector.shape_cast %4 : vector<16x32xf32> to vector<1x16x32xf32>
    %c0_4 = arith.constant 0 : index
    %c0_5 = arith.constant 0 : index
    %6 = vector.load %arg3[%c0_4, %c0_5] : memref<3x32xf32, #tpu.memory_space<vmem>>, vector<3x32xf32>
    %7 = vector.extract_strided_slice %6 {offsets = [0, 0], sizes = [1, 32], strides = [1, 1]} : vector<3x32xf32> to vector<1x32xf32>
    %8 = vector.extract_strided_slice %6 {offsets = [1, 0], sizes = [1, 32], strides = [1, 1]} : vector<3x32xf32> to vector<1x32xf32>
    %9 = vector.extract_strided_slice %6 {offsets = [2, 0], sizes = [1, 32], strides = [1, 1]} : vector<3x32xf32> to vector<1x32xf32>
    %cst_6 = arith.constant dense<0.000000e+00> : vector<1x32xf32>
    %10 = vector.multi_reduction <add>, %5, %cst_6 [1] : vector<1x16x32xf32> to vector<1x32xf32>
    %11 = arith.mulf %5, %5 : vector<1x16x32xf32>
    %cst_7 = arith.constant dense<0.000000e+00> : vector<1x32xf32>
    %12 = vector.multi_reduction <add>, %11, %cst_7 [1] : vector<1x16x32xf32> to vector<1x32xf32>
    %cst_8 = arith.constant 1.600000e+01 : f32
    %13 = vector.broadcast %cst_8 : f32 to vector<1x32xf32>
    %14 = arith.mulf %13, %7 : vector<1x32xf32>
    %15 = arith.addf %10, %14 : vector<1x32xf32>
    %cst_9 = arith.constant 2.000000e+00 : f32
    %16 = vector.broadcast %cst_9 : f32 to vector<1x32xf32>
    %17 = arith.mulf %16, %7 : vector<1x32xf32>
    %18 = arith.mulf %17, %10 : vector<1x32xf32>
    %19 = arith.addf %12, %18 : vector<1x32xf32>
    %20 = arith.mulf %7, %7 : vector<1x32xf32>
    %cst_10 = arith.constant 1.600000e+01 : f32
    %21 = vector.broadcast %cst_10 : f32 to vector<1x32xf32>
    %22 = arith.mulf %21, %20 : vector<1x32xf32>
    %23 = arith.addf %19, %22 : vector<1x32xf32>
    %24 = tpu.concatenate %15, %23 in 0 : vector<1x32xf32>, vector<1x32xf32> -> vector<2x32xf32>
    %c0_11 = arith.constant 0 : index
    %c0_12 = arith.constant 0 : index
    %25 = vector.load %arg4[%c0_11, %c0_12] : memref<32x32xf32, #tpu.memory_space<vmem>>, vector<32x32xf32>
    %cst_13 = arith.constant dense<0.000000e+00> : vector<2x32xf32>
    %26 = tpu.matmul %24, %25, %cst_13 {dimension_numbers = #tpu.dot_dimension_numbers<[1], [0], [0], [1], [0, 0, 1, 1], [], []>} : vector<2x32xf32>, vector<32x32xf32>, vector<2x32xf32> -> vector<2x32xf32>
    %c0_14 = arith.constant 0 : index
    %c0_15 = arith.constant 0 : index
    %27 = vector.load %arg5[%c0_14, %c0_15] : memref<32x32xf32, #tpu.memory_space<vmem>>, vector<32x32xf32>
    %cst_16 = arith.constant dense<0.000000e+00> : vector<2x32xf32>
    %28 = tpu.matmul %26, %27, %cst_16 {dimension_numbers = #tpu.dot_dimension_numbers<[1], [0], [0], [1], [0, 0, 1, 1], [], []>} : vector<2x32xf32>, vector<32x32xf32>, vector<2x32xf32> -> vector<2x32xf32>
    %cst_17 = arith.constant 6.250000e-02 : f32
    %29 = vector.broadcast %cst_17 : f32 to vector<2x32xf32>
    %30 = arith.mulf %28, %29 : vector<2x32xf32>
    %31 = vector.extract_strided_slice %30 {offsets = [0, 0], sizes = [1, 32], strides = [1, 1]} : vector<2x32xf32> to vector<1x32xf32>
    %32 = vector.extract_strided_slice %30 {offsets = [1, 0], sizes = [1, 32], strides = [1, 1]} : vector<2x32xf32> to vector<1x32xf32>
    %33 = arith.mulf %31, %31 : vector<1x32xf32>
    %34 = arith.subf %32, %33 : vector<1x32xf32>
    %cst_18 = arith.constant 0.000000e+00 : f32
    %35 = vector.broadcast %cst_18 : f32 to vector<1x32xf32>
    %36 = arith.maximumf %34, %35 : vector<1x32xf32>
    %cst_19 = arith.constant 9.99999974E-6 : f32
    %37 = vector.broadcast %cst_19 : f32 to vector<1x32xf32>
    %38 = arith.addf %36, %37 : vector<1x32xf32>
    %39 = math.rsqrt %38 : vector<1x32xf32>
    %40 = arith.mulf %39, %8 : vector<1x32xf32>
    %41 = arith.subf %7, %31 : vector<1x32xf32>
    %42 = arith.mulf %41, %40 : vector<1x32xf32>
    %43 = arith.addf %9, %42 : vector<1x32xf32>
    %44 = vector.shape_cast %40 : vector<1x32xf32> to vector<1x1x32xf32>
    %45 = vector.broadcast %44 : vector<1x1x32xf32> to vector<1x16x32xf32>
    %46 = arith.mulf %5, %45 : vector<1x16x32xf32>
    %47 = vector.shape_cast %43 : vector<1x32xf32> to vector<1x1x32xf32>
    %48 = vector.broadcast %47 : vector<1x1x32xf32> to vector<1x16x32xf32>
    %49 = arith.addf %46, %48 : vector<1x16x32xf32>
    %cst_20 = arith.constant 0.000000e+00 : f32
    %50 = vector.broadcast %cst_20 : f32 to vector<1x16x32xf32>
    %51 = arith.maximumf %49, %50 : vector<1x16x32xf32>
    %52 = vector.shape_cast %51 : vector<1x16x32xf32> to vector<16x32xf32>
    %53 = arith.truncf %52 : vector<16x32xf32> to vector<16x32xbf16>
    %c0_21 = arith.constant 0 : index
    %c0_22 = arith.constant 0 : index
    %54 = vector.load %arg6[%c0_21, %c0_22] : memref<32x128xbf16, #tpu.memory_space<vmem>>, vector<32x128xbf16>
    %cst_23 = arith.constant dense<0.000000e+00> : vector<16x128xf32>
    %55 = tpu.matmul %53, %54, %cst_23 {dimension_numbers = #tpu.dot_dimension_numbers<[1], [0], [0], [1], [0, 0, 1, 1], [], []>} : vector<16x32xbf16>, vector<32x128xbf16>, vector<16x128xf32> -> vector<16x128xf32>
    %56 = vector.shape_cast %55 : vector<16x128xf32> to vector<1x16x128xf32>
    %c0_24 = arith.constant 0 : index
    %c0_25 = arith.constant 0 : index
    %57 = vector.load %arg7[%c0_24, %c0_25] : memref<3x128xf32, #tpu.memory_space<vmem>>, vector<3x128xf32>
    %58 = vector.extract_strided_slice %57 {offsets = [0, 0], sizes = [1, 128], strides = [1, 1]} : vector<3x128xf32> to vector<1x128xf32>
    %59 = vector.extract_strided_slice %57 {offsets = [1, 0], sizes = [1, 128], strides = [1, 1]} : vector<3x128xf32> to vector<1x128xf32>
    %60 = vector.extract_strided_slice %57 {offsets = [2, 0], sizes = [1, 128], strides = [1, 1]} : vector<3x128xf32> to vector<1x128xf32>
    %cst_26 = arith.constant dense<0.000000e+00> : vector<1x128xf32>
    %61 = vector.multi_reduction <add>, %56, %cst_26 [1] : vector<1x16x128xf32> to vector<1x128xf32>
    %62 = arith.mulf %56, %56 : vector<1x16x128xf32>
    %cst_27 = arith.constant dense<0.000000e+00> : vector<1x128xf32>
    %63 = vector.multi_reduction <add>, %62, %cst_27 [1] : vector<1x16x128xf32> to vector<1x128xf32>
    %cst_28 = arith.constant 1.600000e+01 : f32
    %64 = vector.broadcast %cst_28 : f32 to vector<1x128xf32>
    %65 = arith.mulf %64, %58 : vector<1x128xf32>
    %66 = arith.addf %61, %65 : vector<1x128xf32>
    %cst_29 = arith.constant 2.000000e+00 : f32
    %67 = vector.broadcast %cst_29 : f32 to vector<1x128xf32>
    %68 = arith.mulf %67, %58 : vector<1x128xf32>
    %69 = arith.mulf %68, %61 : vector<1x128xf32>
    %70 = arith.addf %63, %69 : vector<1x128xf32>
    %71 = arith.mulf %58, %58 : vector<1x128xf32>
    %cst_30 = arith.constant 1.600000e+01 : f32
    %72 = vector.broadcast %cst_30 : f32 to vector<1x128xf32>
    %73 = arith.mulf %72, %71 : vector<1x128xf32>
    %74 = arith.addf %70, %73 : vector<1x128xf32>
    %75 = tpu.concatenate %66, %74 in 0 : vector<1x128xf32>, vector<1x128xf32> -> vector<2x128xf32>
    %c0_31 = arith.constant 0 : index
    %c0_32 = arith.constant 0 : index
    %76 = vector.load %arg8[%c0_31, %c0_32] : memref<128x32xf32, #tpu.memory_space<vmem>>, vector<128x32xf32>
    %cst_33 = arith.constant dense<0.000000e+00> : vector<2x32xf32>
    %77 = tpu.matmul %75, %76, %cst_33 {dimension_numbers = #tpu.dot_dimension_numbers<[1], [0], [0], [1], [0, 0, 1, 1], [], []>} : vector<2x128xf32>, vector<128x32xf32>, vector<2x32xf32> -> vector<2x32xf32>
    %c0_34 = arith.constant 0 : index
    %c0_35 = arith.constant 0 : index
    %78 = vector.load %arg9[%c0_34, %c0_35] : memref<32x128xf32, #tpu.memory_space<vmem>>, vector<32x128xf32>
    %cst_36 = arith.constant dense<0.000000e+00> : vector<2x128xf32>
    %79 = tpu.matmul %77, %78, %cst_36 {dimension_numbers = #tpu.dot_dimension_numbers<[1], [0], [0], [1], [0, 0, 1, 1], [], []>} : vector<2x32xf32>, vector<32x128xf32>, vector<2x128xf32> -> vector<2x128xf32>
    %cst_37 = arith.constant 6.250000e-02 : f32
    %80 = vector.broadcast %cst_37 : f32 to vector<2x128xf32>
    %81 = arith.mulf %79, %80 : vector<2x128xf32>
    %82 = vector.extract_strided_slice %81 {offsets = [0, 0], sizes = [1, 128], strides = [1, 1]} : vector<2x128xf32> to vector<1x128xf32>
    %83 = vector.extract_strided_slice %81 {offsets = [1, 0], sizes = [1, 128], strides = [1, 1]} : vector<2x128xf32> to vector<1x128xf32>
    %84 = arith.mulf %82, %82 : vector<1x128xf32>
    %85 = arith.subf %83, %84 : vector<1x128xf32>
    %cst_38 = arith.constant 0.000000e+00 : f32
    %86 = vector.broadcast %cst_38 : f32 to vector<1x128xf32>
    %87 = arith.maximumf %85, %86 : vector<1x128xf32>
    %cst_39 = arith.constant 9.99999974E-6 : f32
    %88 = vector.broadcast %cst_39 : f32 to vector<1x128xf32>
    %89 = arith.addf %87, %88 : vector<1x128xf32>
    %90 = math.rsqrt %89 : vector<1x128xf32>
    %91 = arith.mulf %90, %59 : vector<1x128xf32>
    %92 = arith.subf %58, %82 : vector<1x128xf32>
    %93 = arith.mulf %92, %91 : vector<1x128xf32>
    %94 = arith.addf %60, %93 : vector<1x128xf32>
    %c0_40 = arith.constant 0 : index
    %c0_41 = arith.constant 0 : index
    %c0_42 = arith.constant 0 : index
    %95 = vector.load %arg1[%c0_40, %c0_41, %c0_42] : memref<1x16x128xf32, #tpu.memory_space<vmem>>, vector<1x16x128xf32>
    %96 = vector.shape_cast %91 : vector<1x128xf32> to vector<1x1x128xf32>
    %97 = vector.broadcast %96 : vector<1x1x128xf32> to vector<1x16x128xf32>
    %98 = arith.mulf %56, %97 : vector<1x16x128xf32>
    %99 = arith.addf %95, %98 : vector<1x16x128xf32>
    %100 = vector.shape_cast %94 : vector<1x128xf32> to vector<1x1x128xf32>
    %101 = vector.broadcast %100 : vector<1x1x128xf32> to vector<1x16x128xf32>
    %102 = arith.addf %99, %101 : vector<1x16x128xf32>
    %cst_43 = arith.constant 0.000000e+00 : f32
    %103 = vector.broadcast %cst_43 : f32 to vector<1x16x128xf32>
    %104 = arith.maximumf %102, %103 : vector<1x16x128xf32>
    %c0_44 = arith.constant 0 : index
    %c0_45 = arith.constant 0 : index
    %c0_46 = arith.constant 0 : index
    %105 = vector.load %arg10[%c0_44, %c0_45, %c0_46] : memref<1x16x128xf32, #tpu.memory_space<vmem>>, vector<1x16x128xf32>
    tpu.vector_store %arg10[%c0_44, %c0_45, %c0_46], %104 {strides = array<i32>} : memref<1x16x128xf32, #tpu.memory_space<vmem>>, vector<1x16x128xf32>,
    return
  }
  func.func @transform_0(%arg0: i32) -> (i32, i32, i32) {
    %c0_i32 = arith.constant 0 : i32
    %c0_i32_0 = arith.constant 0 : i32
    %c0_i32_1 = arith.constant 0 : i32
    return %arg0, %c0_i32, %c0_i32_0 : i32, i32, i32
  }
  func.func @transform_1(%arg0: i32) -> (i32, i32) {
    %c0_i32 = arith.constant 0 : i32
    %c0_i32_0 = arith.constant 0 : i32
    %c0_i32_1 = arith.constant 0 : i32
    return %c0_i32, %c0_i32_0 : i32, i32
  }
  func.func @transform_2(%arg0: i32) -> (i32, i32) {
    %c0_i32 = arith.constant 0 : i32
    %c0_i32_0 = arith.constant 0 : i32
    %c0_i32_1 = arith.constant 0 : i32
    return %c0_i32, %c0_i32_0 : i32, i32
  }
  func.func @transform_3(%arg0: i32) -> (i32, i32) {
    %c0_i32 = arith.constant 0 : i32
    %c0_i32_0 = arith.constant 0 : i32
    %c0_i32_1 = arith.constant 0 : i32
    return %c0_i32, %c0_i32_0 : i32, i32
  }
  func.func @transform_4(%arg0: i32) -> (i32, i32) {
    %c0_i32 = arith.constant 0 : i32
    %c0_i32_0 = arith.constant 0 : i32
    %c0_i32_1 = arith.constant 0 : i32
    return %c0_i32, %c0_i32_0 : i32, i32
  }
  func.func @transform_5(%arg0: i32) -> (i32, i32) {
    %c0_i32 = arith.constant 0 : i32
    %c0_i32_0 = arith.constant 0 : i32
    %c0_i32_1 = arith.constant 0 : i32
    return %c0_i32, %c0_i32_0 : i32, i32
  }
  func.func @transform_6(%arg0: i32) -> (i32, i32) {
    %c0_i32 = arith.constant 0 : i32
    %c0_i32_0 = arith.constant 0 : i32
    %c0_i32_1 = arith.constant 0 : i32
    return %c0_i32, %c0_i32_0 : i32, i32
  }
  func.func @transform_7(%arg0: i32) -> (i32, i32) {
    %c0_i32 = arith.constant 0 : i32
    %c0_i32_0 = arith.constant 0 : i32
    %c0_i32_1 = arith.constant 0 : i32
    return %c0_i32, %c0_i32_0 : i32, i32
  }
  func.func @transform_8(%arg0: i32) -> (i32, i32) {
    %c0_i32 = arith.constant 0 : i32
    %c0_i32_0 = arith.constant 0 : i32
    %c0_i32_1 = arith.constant 0 : i32
    return %c0_i32, %c0_i32_0 : i32, i32
  }
  func.func @transform_9(%arg0: i32) -> (i32, i32, i32) {
    %c0_i32 = arith.constant 0 : i32
    %c0_i32_0 = arith.constant 0 : i32
    %c0_i32_1 = arith.constant 0 : i32
    return %arg0, %c0_i32, %c0_i32_0 : i32, i32, i32
  }
}

</mosaic_0001>

<bundles_post_ra>
// kernel: tpu_custom_call.1
= control target key start
LH: loop header
LB: loop body
LE: loop exit
PB: predicated region body
PF: predicated region fallthrough
CT: control target
= control target key end

     0   :  { %14 = vsyncpa [#allocation3], 0  ;;  %s1717_s0 = inlined_call_operand.vmem [shape: f32[2,16,128], index: 0, kind: input, shape index: {}]   ;;  %s1718_s1 = inlined_call_operand.vmem [shape: bf16[128,32], index: 1, kind: input, shape index: {}]   ;;  %s1719_s2 = inlined_call_operand.vmem [shape: f32[3,32], index: 2, kind: input, shape index: {}]   ;;  %s1720_s3 = inlined_call_operand.vmem [shape: f32[32,32], index: 3, kind: input, shape index: {}]   ;;  %s1721_s4 = inlined_call_operand.vmem [shape: f32[32,32], index: 4, kind: input, shape index: {}]   ;;  %s1722_s5 = inlined_call_operand.vmem [shape: bf16[32,128], index: 5, kind: input, shape index: {}]   ;;  %s1723_s6 = inlined_call_operand.vmem [shape: f32[3,128], index: 6, kind: input, shape index: {}]   ;;  %s1724_s7 = inlined_call_operand.vmem [shape: f32[128,32], index: 7, kind: input, shape index: {}]   ;;  %s1725_s8 = inlined_call_operand.vmem [shape: f32[32,128], index: 8, kind: input, shape index: {}]   ;;  %s1726_s9 = inlined_call_operand.hbm [shape: f32[2,16,128], index: 9, kind: output, shape index: {}]  }
   0x1   :  { %16 = vsyncpa [#allocation3 + $0x1], 0  ;;  %s1416_s30 = smov 0   ;;  %s1418_s10 = smov 0  }
   0x2   :  { %s1420_s11 = smov 0   ;;  %s1422_s12 = smov 0  }
   0x3 LB: > { %s1437_s13 = sadd.s32 4294967295, %s1358_s12   ;;  %s1028_s14 = sadd.s32 4294967294, %s1358_s12   ;;  %s1358_s12 = sphi %s1422_s12, %s1732_s12   ;;  %s1354_s11 = sphi %s1420_s11, %s1731_s11   ;;  %s1350_s10 = sphi %s1418_s10, %s1730_s10   ;;  %s1346_s30 = sphi %s1416_s30, %s1729_s30  }
   0x4   : > { %s1441_s15 = sadd.s32 1, %s1358_s12   ;;  %s223_s16 = sadd.s32 1, %s1354_s11 }
   0x5   : > { %s220_s17 = ssub.s32 %s1358_s12, %s1441_s15  ;;  %p233_p0 = scmp.ne.s32.totalorder %s1354_s11, %s1350_s10 }
   0x6   : > { %p221_p1 = scmp.eq.s32.totalorder %s220_s17, 0  ;;  %p234_p2 = scmp.eq.s32.totalorder %s1437_s13, 1 }
   0x7   : > { %p239_p3 = scmp.ne.s32.totalorder %s1350_s10, %s1346_s30  ;;  %p240_p4 = scmp.eq.s32.totalorder %s1028_s14, 1 }
   0x8   : > { %s1452_s18 = scalar_select %p221_p1, %s1354_s11, %s223_s16  }
   0x9   : > { %p1454_p5 = por %p234_p2, %p233_p0  ;;  %p1458_p6 = por %p240_p4, %p239_p3 }
   0xa   : > { %p1031_p7 = scmp.ge.s32.totalorder %s1358_s12, 1  ;;  %p290_p8 = scmp.lt.s32.totalorder %s1358_s12, 3 }
   0xc   : > { %p291_p9 = pnand %p1031_p7, %p290_p8 }
   0xd   : > { %v1282_v0 = vld [vmem:[%s1718_s1] sm:$0xff] (!%p291_p9)   ;;  %v1360_v1 = vmov (!%p291_p9), 0.0   ;;  %v1283_v2 = vld [vmem:[%s1718_s1 + $0x8] sm:$0xff] (!%p291_p9)   ;;  %vm1361_vm0 = vmmov (!%p291_p9), 0   ;;  %v1284_v3 = vld [vmem:[%s1718_s1 + $0x10] sm:$0xff] (!%p291_p9)   ;;  %p326_p10 = scmp.lt.s32.totalorder (!%p291_p9), %s1437_s13, 1 }
   0xe   : > { %294 = sbr.rel (%p291_p9) target bundleno = 1464 (0x5b8), region = 56  ;;  %1100 = vmatprep.subr.bf16.mxu0 (!%p291_p9), %v1360_v1  ;;  %1116 = vmatprep.mubr.msk.bf16.mxu0 (!%p291_p9), %vm1361_vm0, %v1360_v1  ;;  %v1285_v4 = vld [vmem:[%s1718_s1 + $0x18] sm:$0xff] (!%p291_p9)   ;;  %v1286_v5 = vld [vmem:[%s1718_s1 + $0x20] sm:$0xff] (!%p291_p9)   ;;  %v1287_v6 = vld [vmem:[%s1718_s1 + $0x28] sm:$0xff] (!%p291_p9)   ;;  %v1362_v17 = vmov (!%p291_p9), 0.0|0.0   ;;  %vm441_vm1 = vcmask (!%p291_p9), 261120  }
   0xf   : > { %1101 = vmatpush3.bf16.msra.mxu0 (!%p291_p9), %v1282_v0  ;;  %1139 = vmatprep.mubr.msk.f32.mxu1 (!%p291_p9), %vm1361_vm0, %v1360_v1  ;;  %v1288_v7 = vld [vmem:[%s1718_s1 + $0x30] sm:$0xff] (!%p291_p9)   ;;  %v1289_v8 = vld [vmem:[%s1718_s1 + $0x38] sm:$0xff] (!%p291_p9)   ;;  %v475_v12 = vld [vmem:[%s1720_s3] sm:$0xff] (!%p291_p9)  ;;  %vm473_vm2 = vcmask (!%p291_p9), 1040384   ;;  %s1055_s24 = sshll.u32 (!%p291_p9), %s1437_s13, 8 }
  0x10   : > { %1102 = vmatprep.subr.bf16.mxu0 (!%p291_p9), %v1360_v1  ;;  %v476_v13 = vld [vmem:[%s1720_s3 + $0x8] sm:$0xff] (!%p291_p9)  ;;  %v477_v15 = vld [vmem:[%s1720_s3 + $0x10] sm:$0xff] (!%p291_p9)  ;;  %v478_v16 = vld [vmem:[%s1720_s3 + $0x18] sm:$0xff] (!%p291_p9)  ;;  %1202 = vmatprep.subr.bf16.mxu1 (!%p291_p9), %v1362_v17  ;;  %s1672_s29 = scalar_lea.hbm (!%p291_p9), %s1726_s9, %s1055_s24 }
  0x11   : > { %v1197_v14 = vpack.c.bf16 (!%p291_p9), %v476_v13, %v475_v12  ;;  %v1200_v18 = vpack.c.bf16 (!%p291_p9), %v478_v16, %v477_v15  ;;  %v552_v19 = vld [vmem:[%s1721_s4] sm:$0xff] (!%p291_p9)  ;;  %v553_v20 = vld [vmem:[%s1721_s4 + $0x8] sm:$0xff] (!%p291_p9)  ;;  %v554_v21 = vld [vmem:[%s1721_s4 + $0x10] sm:$0xff] (!%p291_p9) }
  0x12   : > { %v1203_v22 = vpack.c.bf16 (!%p291_p9), %v553_v20, %v552_v19  ;;  %v555_v23 = vld [vmem:[%s1721_s4 + $0x18] sm:$0xff] (!%p291_p9)  ;;  %v440_v42 = vld [vmem:[%s1719_s2] sm:$0x7] (!%p291_p9)  ;;  %v1291_v63 = vld [vmem:[%s1722_s5 + $0x8] sm:$0xff] (!%p291_p9)  }
  0x13   : > { %1103 = vmatpush3.bf16.msra.mxu0 (!%p291_p9), %v1283_v2  ;;  %v1206_v24 = vpack.c.bf16 (!%p291_p9), %v555_v23, %v554_v21  ;;  %v464_v47 = vmul.f32 (!%p291_p9), 2.0, %v440_v42  ;;  %v467_v48 = vmul.f32 (!%p291_p9), %v440_v42, %v440_v42  ;;  %v462_v54 = vmul.f32 (!%p291_p9), 16.0, %v440_v42  ;;  %v1290_v62 = vld [vmem:[%s1722_s5] sm:$0xff] (!%p291_p9)  }
  0x14   : > { %1104 = vmatprep.subr.bf16.mxu0 (!%p291_p9), %v1360_v1  ;;  %1204 = vmatpush3.bf16.msra.mxu1 (!%p291_p9), %v1203_v22 }
  0x15   : > { %s327_s16 = scalar_select %p326_p10, %s1437_s13, 1  ;;  %1205 = vmatprep.subr.bf16.mxu1 %v1362_v17  ;;  %v468_v53 = vmul.f32 16.0, %v467_v48 }
  0x17   : > { %1105 = vmatpush3.bf16.msra.mxu0 %v1284_v3  ;;  %s1054_s22 = sshll.u32 %s327_s16, 4  ;;  %s1363_s16 = smov [#allocation2]  }
  0x18   : > { %1106 = vmatprep.subr.bf16.mxu0 %v1360_v1  ;;  %s330_s27 = scalar_lea.vmem %s1717_s0, %s1054_s22  ;;  %1207 = vmatpush3.bf16.msra.mxu1 %v1206_v24  ;;  %s323_s22 = sand.u32 1, %s1350_s10  }
  0x19   : > { %v1504_v9 = vld [vmem:[%s330_s27] sm:$0xff]  ;;  %v1506_v10 = vld [vmem:[%s330_s27 + $0x8] sm:$0xff]  ;;  %1142 = vmatprep.subr.bf16.mxu1 %v1360_v1  ;;  %s1032_s23 = sshll.u32 %s323_s22, 4  ;;  %s1676_s14 = scalar_lea.sflag [#allocation3], %s323_s22 }
  0x1a   : > { %v334_v11 = vpack.c.bf16 %v1506_v10, %v1504_v9  ;;  %s325_s25 = scalar_lea.vmem [#allocation2], %s1032_s23  ;;  %s1300_s17 = sshll.u32 %s1363_s16, 4  ;;  %s1301_s17 = int_to_ptr.vmem [resolvable:$false] %s1300_s17 }
  0x1b   : > { %1107 = vmatpush3.bf16.msra.mxu0 %v1285_v4  ;;  %s966_s26 = sshll.u32 %s325_s25, 4  ;;  %s1302_s21 = scalar_lea.vmem %s1301_s17, 512  ;;  %s1674_s26 = int_to_ptr.vmem [resolvable:$true] %s966_s26 }
  0x1c   : > { %1108 = vmatprep.subr.bf16.mxu0 %v1360_v1  ;;  %s1296_s13 = scalar_lea.vmem %s1674_s26, 256  ;;  %p1303_p0 = scmp.lt.s32.totalorder %s1674_s26, %s1301_s17 }
  0x1d   : > { %p1297_p11 = scmp.ne.s32.totalorder %s1674_s26, %s1296_s13  ;;  %p1304_p1 = scmp.lt.s32.totalorder %s1302_s21, %s1296_s13 }
  0x1f   : > { %1109 = vmatpush3.bf16.msra.mxu0 %v1286_v5  ;;  %p1298_p12 = pnand %p1297_p11, %p1454_p5  ;;  %p1305_p2 = por %p1304_p1, %p1303_p0 }
  0x20   : > { %1110 = vmatprep.subr.bf16.mxu0 %v1360_v1 }
  0x21   : > { %p1299_p13 = pneg %p1298_p12 }
  0x23   : > { %1111 = vmatpush3.bf16.msra.mxu0 %v1287_v6  ;;  %p1306_p3 = pnand %p1305_p2, %p1299_p13 }
  0x24   : > { %1112 = vmatprep.subr.bf16.mxu0 %v1360_v1 }
  0x27   : > { %1113 = vmatpush3.bf16.msra.mxu0 %v1288_v7 }
  0x28   : > { %1114 = vmatprep.subr.bf16.mxu0 %v1360_v1 }
  0x2b   : > { %1115 = vmatpush3.bf16.msra.mxu0 %v1289_v8 }
  0x2c   : > { %1196 = vmatprep.subr.bf16.mxu0 %v1362_v17 }
  0x2e   : > { %1117 = vmatmul.mubr.bf16.vlgmr.msra.gmra.mrb[0].mxu0 %v334_v11  ;;  %v648_v11 = vlaneseq }
  0x2f   : > { %1128 = vmatprep.mubr.msk.f32.mxu0 %vm1361_vm0, %v1360_v1  ;;  %1198 = vmatpush3.bf16.msra.mxu0 %v1197_v14 }
  0x30   : > { %1199 = vmatprep.subr.bf16.mxu0 %v1362_v17  ;;  %v1575_v12 = vshrl.u32 %v648_v11, 7 }
  0x32   : > { %v650_v13 = vsub.s32 1, %v1575_v12  ;;  %v656_v24 = vsub.s32 2, %v1575_v12 }
  0x33   : > { %1201 = vmatpush3.bf16.msra.mxu0 %v1200_v18 }
  0x34   : > { %1232 = vmatprep.subr.bf16.mxu0 %v1362_v17 }
 0x101   : > { %v1543_v25 = vpop.f32.mrb[0].mxu0 }
 0x102   : > { %v451_v26 = vmul.f32 %v1543_v25, %v1543_v25  ;;  %v1118_v27 = vpop.f32.mrb[1].mxu0  ;;  %v442_v29 = vsel %vm441_vm1, %v1543_v25, 0.0 }
 0x103   : > { %v1547_v28 = vpop.f32.mrb[2].mxu0 }
 0x104   : > { %v443_v30 = vsel %vm441_vm1, %v1547_v28, 0.0  ;;  %v452_v31 = vmul.f32 %v1547_v28, %v1547_v28  ;;  %v1119_v32 = vpop.f32.mrb[3].mxu0  ;;  %v453_v34 = vsel %vm441_vm1, %v451_v26, 0.0 }
 0x105   : > { %v444_v33 = vadd.f32 %v443_v30, %v442_v29  ;;  %v753_v32 = vld [vmem:[%s1724_s7 + $0x8] sm:$0xff] }
 0x106   : > { %v454_v35 = vsel %vm441_vm1, %v452_v31, 0.0  ;;  %v752_v31 = vld [vmem:[%s1724_s7] sm:$0xff] }
 0x107   : > { %v445_v36 = vrot.slane %v444_v33, 4  ;;  %v455_v37 = vadd.f32 %v454_v35, %v453_v34  ;;  %v754_v35 = vld [vmem:[%s1724_s7 + $0x10] sm:$0xff] }
 0x109   : > { %v446_v38 = vadd.f32 %v445_v36, %v444_v33  ;;  %v456_v39 = vrot.slane %v455_v37, 4  ;;  %v755_v36 = vld [vmem:[%s1724_s7 + $0x18] sm:$0xff] }
 0x10b   : > { %v447_v40 = vrot.slane %v446_v38, 2  ;;  %v457_v41 = vadd.f32 %v456_v39, %v455_v37  ;;  %v1212_v37 = vpack.c.bf16 %v755_v36, %v754_v35  ;;  %v757_v39 = vld [vmem:[%s1724_s7 + $0x28] sm:$0xff] }
 0x10d   : > { %v448_v43 = vadd.f32 %v447_v40, %v446_v38  ;;  %v458_v44 = vrot.slane %v457_v41, 2  ;;  %v756_v38 = vld [vmem:[%s1724_s7 + $0x20] sm:$0xff] }
 0x10e   : > { %v1215_v40 = vpack.c.bf16 %v757_v39, %v756_v38 }
 0x10f   : > { %v449_v45 = vrot.slane %v448_v43, 1  ;;  %v459_v46 = vadd.f32 %v458_v44, %v457_v41  ;;  %v759_v41 = vld [vmem:[%s1724_s7 + $0x38] sm:$0xff]  ;;  %v761_v44 = vld [vmem:[%s1724_s7 + $0x48] sm:$0xff] }
 0x111   : > { %v450_v49 = vadd.f32 %v449_v45, %v448_v43  ;;  %v460_v50 = vrot.slane %v459_v46, 1  ;;  %v760_v43 = vld [vmem:[%s1724_s7 + $0x40] sm:$0xff] }
 0x112   : > { %v1221_v45 = vpack.c.bf16 %v761_v44, %v760_v43 }
 0x113   : > { %v461_v51 = vadd.f32 %v460_v50, %v459_v46  ;;  %v465_v52 = vmul.f32 %v464_v47, %v450_v49  ;;  %v463_v57 = vadd.f32 %v462_v54, %v450_v49  ;;  %v762_v46 = vld [vmem:[%s1724_s7 + $0x50] sm:$0xff]  ;;  %v763_v47 = vld [vmem:[%s1724_s7 + $0x58] sm:$0xff]  ;;  %v764_v49 = vld [vmem:[%s1724_s7 + $0x60] sm:$0xff] }
 0x114   : > { %v1224_v48 = vpack.c.bf16 %v763_v47, %v762_v46  ;;  %v765_v50 = vld [vmem:[%s1724_s7 + $0x68] sm:$0xff] }
 0x115   : > { %v466_v55 = vadd.f32 %v465_v52, %v461_v51  ;;  %v1227_v51 = vpack.c.bf16 %v765_v50, %v764_v49  ;;  %v766_v52 = vld [vmem:[%s1724_s7 + $0x70] sm:$0xff] }
 0x117   : > { %v469_v56 = vadd.f32 %v468_v53, %v466_v55  ;;  %v767_v53 = vld [vmem:[%s1724_s7 + $0x78] sm:$0xff]  ;;  %v838_v55 = vld [vmem:[%s1725_s8] sm:$0xff] }
 0x118   : > { %v1230_v54 = vpack.c.bf16 %v767_v53, %v766_v52 }
 0x119   : > { %v471_v58 = vrot.slane %v469_v56, 7  ;;  %v839_v56 = vld [vmem:[%s1725_s8 + $0x8] sm:$0xff] }
 0x11b   : > { %v474_v59 = vsel %vm473_vm2, %v463_v57, %v471_v58  ;;  %v840_v57 = vld [vmem:[%s1725_s8 + $0x10] sm:$0xff]  ;;  %v1233_v58 = vpack.c.bf16 %v839_v56, %v838_v55 }
 0x11c   : > { %1129 = vmatmul.mubr.msk.f32.vlgmr.msra.gmra.mrb[4].mxu0 %vm441_vm1, %v474_v59  ;;  %v841_v59 = vld [vmem:[%s1725_s8 + $0x18] sm:$0xff] }
 0x11d   : > { %1193 = vmatprep.mubr.msk.f32.mxu0 %vm1361_vm0, %v1360_v1  ;;  %1234 = vmatpush3.bf16.msra.mxu0 %v1233_v58 }
 0x11e   : > { %1235 = vmatprep.subr.bf16.mxu0 %v1362_v17 }
 0x1ef   : > { %v548_v60 = vpop.f32.mrb[4].mxu0 }
 0x1f0   : > { %v1130_v61 = vpop.f32.mrb[5].mxu0  ;;  %1140 = vmatmul.mubr.msk.f32.vlgmr.msra.gmra.mrb[0].mxu1 %vm441_vm1, %v548_v60  ;;  %v1236_v60 = vpack.c.bf16 %v841_v59, %v840_v57 }
 0x1f1   : > { %1146 = vmatprep.mubr.msk.bf16.mxu1 %vm1361_vm0, %v1360_v1  ;;  %1143 = vmatpush3.bf16.msra.mxu1 %v1290_v62 }
 0x1f2   : > { %1144 = vmatprep.subr.bf16.mxu1 %v1360_v1  ;;  %1237 = vmatpush3.bf16.msra.mxu0 %v1236_v60 }
 0x1f5   : > { %1145 = vmatpush3.bf16.msra.mxu1 %v1291_v63 }
 0x1f6   : > { %1208 = vmatprep.subr.bf16.mxu1 %v1362_v17 }
 0x2c3   : > { %v625_v0 = vpop.f32.mrb[0].mxu1 }
 0x2c4   : > { %v629_v2 = vmul.f32 0.0625, %v625_v0  ;;  %v1141_v3 = vpop.f32.mrb[1].mxu1 }
 0x2c6   : > { %v630_v4 = vmul.f32 %v629_v2, %v629_v2  ;;  %v639_v16 = vsub.f32 %v440_v42, %v629_v2 }
 0x2c8   : > { %v632_v5 = vrot.slane %v630_v4, 7 }
 0x2ca   : > { %v634_v6 = vsub.f32 %v629_v2, %v632_v5 }
 0x2cc   : > { %v635_v7 = vmax.f32 %v634_v6, 0.0 }
 0x2ce   : > { %v636_v8 = vadd.f32 1e-05, %v635_v7 }
 0x2d0   : > { %1292 = vrsqrt.f32 %v636_v8 }
 0x2da   : > { %v1293_v14 = vpop.eup %1292 }
 0x2db   : > { %v638_v15 = vmul.f32 %v1293_v14, %v440_v42 }
 0x2dd   : > { %v641_v18 = vrot.slane %v638_v15, 1  ;;  %v651_v19 = vrot.slane %v638_v15, %v650_v13  ;;  %v723_v15 = vld [vmem:[%s1723_s6] sm:$0x7] }
 0x2df   : > { %v643_v20 = vmul.f32 %v641_v18, %v639_v16  ;;  %v652_v21 = vmul.f32 %v651_v19, %v1543_v25  ;;  %v653_v22 = vmul.f32 %v651_v19, %v1547_v28  ;;  %v1209_v28 = vpack.c.bf16 %v753_v32, %v752_v31 }
 0x2e1   : > { %v645_v23 = vrot.slane %v643_v20, 6  ;;  %v742_v20 = vmul.f32 2.0, %v723_v15 }
 0x2e3   : > { %v647_v26 = vadd.f32 %v645_v23, %v440_v42 }
 0x2e5   : > { %v657_v27 = vrot.slane %v647_v26, %v656_v24 }
 0x2e7   : > { %v658_v29 = vadd.f32 %v657_v27, %v652_v21  ;;  %v659_v30 = vadd.f32 %v657_v27, %v653_v22  ;;  %v745_v21 = vmul.f32 %v723_v15, %v723_v15 }
 0x2e9   : > { %v660_v25 = vmax.f32 %v658_v29, 0.0  ;;  %v661_v33 = vmax.f32 %v659_v30, 0.0  ;;  %v746_v29 = vmul.f32 16.0, %v745_v21  ;;  %v740_v30 = vmul.f32 16.0, %v723_v15 }
 0x2eb   : > { %v662_v34 = vpack.c.bf16 %v661_v33, %v660_v25 }
 0x2ed   : > { %1147 = vmatmul.mubr.msk.bf16.vlgmr.msra.gmra.mrb[4].mxu1 %vm441_vm1, %v662_v34 }
 0x2ee   : > { %1210 = vmatpush3.bf16.msra.mxu1 %v1209_v28  ;;  %1182 = vmatprep.mubr.msk.f32.mxu1 %vm1361_vm0, %v1360_v1  ;;  %v758_v1 = vld [vmem:[%s1724_s7 + $0x30] sm:$0xff] }
 0x2ef   : > { %1211 = vmatprep.subr.bf16.mxu1 %v1362_v17  ;;  %v1218_v42 = vpack.c.bf16 %v759_v41, %v758_v1 }
 0x2f2   : > { %1213 = vmatpush3.bf16.msra.mxu1 %v1212_v37 }
 0x2f3   : > { %1214 = vmatprep.subr.bf16.mxu1 %v1362_v17 }
 0x2f6   : > { %1216 = vmatpush3.bf16.msra.mxu1 %v1215_v40 }
 0x2f7   : > { %1217 = vmatprep.subr.bf16.mxu1 %v1362_v17 }
 0x2fa   : > { %1219 = vmatpush3.bf16.msra.mxu1 %v1218_v42 }
 0x2fb   : > { %1220 = vmatprep.subr.bf16.mxu1 %v1362_v17 }
 0x2fe   : > { %1222 = vmatpush3.bf16.msra.mxu1 %v1221_v45 }
 0x2ff   : > { %1223 = vmatprep.subr.bf16.mxu1 %v1362_v17 }
 0x302   : > { %1225 = vmatpush3.bf16.msra.mxu1 %v1224_v48 }
 0x303   : > { %1226 = vmatprep.subr.bf16.mxu1 %v1362_v17 }
 0x306   : > { %1228 = vmatpush3.bf16.msra.mxu1 %v1227_v51 }
 0x307   : > { %1229 = vmatprep.subr.bf16.mxu1 %v1362_v17 }
 0x30a   : > { %1231 = vmatpush3.bf16.msra.mxu1 %v1230_v54 }
 0x3c0   : > { %v716_v61 = vpop.f32.mrb[4].mxu1 }
 0x3c1   : > { %v1148_v62 = vpop.f32.mrb[5].mxu1  ;;  %v731_v0 = vmul.f32 %v716_v61, %v716_v61 }
 0x3c2   : > { %v719_v63 = vpop.f32.mrb[6].mxu1 }
 0x3c3   : > { %v724_v2 = vadd.f32 %v719_v63, %v716_v61  ;;  %v732_v3 = vmul.f32 %v719_v63, %v719_v63  ;;  %v1149_v4 = vpop.f32.mrb[7].mxu1 }
 0x3c5   : > { %v725_v5 = vrot.slane %v724_v2, 4  ;;  %v733_v6 = vadd.f32 %v732_v3, %v731_v0 }
 0x3c7   : > { %v726_v7 = vadd.f32 %v725_v5, %v724_v2  ;;  %v734_v8 = vrot.slane %v733_v6, 4 }
 0x3c9   : > { %v727_v11 = vrot.slane %v726_v7, 2  ;;  %v735_v14 = vadd.f32 %v734_v8, %v733_v6 }
 0x3cb   : > { %v728_v16 = vadd.f32 %v727_v11, %v726_v7  ;;  %v736_v17 = vrot.slane %v735_v14, 2 }
 0x3cd   : > { %v729_v18 = vrot.slane %v728_v16, 1  ;;  %v737_v19 = vadd.f32 %v736_v17, %v735_v14 }
 0x3cf   : > { %v730_v22 = vadd.f32 %v729_v18, %v728_v16  ;;  %v738_v23 = vrot.slane %v737_v19, 1 }
 0x3d1   : > { %v739_v26 = vadd.f32 %v738_v23, %v737_v19  ;;  %v743_v27 = vmul.f32 %v742_v20, %v730_v22  ;;  %v741_v25 = vadd.f32 %v740_v30, %v730_v22 }
 0x3d3   : > { %v744_v31 = vadd.f32 %v743_v27, %v739_v26 }
 0x3d5   : > { %v747_v32 = vadd.f32 %v746_v29, %v744_v31 }
 0x3d7   : > { %v749_v33 = vrot.slane %v747_v32, 7 }
 0x3d9   : > { %v751_v28 = vsel %vm473_vm2, %v741_v25, %v749_v33 }
 0x3da   : > { %1183 = vmatmul.mubr.f32.vlgmr.msra.gmra.mrb[2].mxu1 %v751_v28 }
 0x4ad   : > { %v834_v34 = vpop.f32.mrb[2].mxu1 }
 0x4ae   : > { %v1184_v35 = vpop.f32.mrb[3].mxu1  ;;  %1194 = vmatmul.mubr.msk.f32.vlgmr.msra.gmra.mrb[6].mxu0 %vm441_vm1, %v834_v34 }
 0x581   : > { %v911_v36 = vpop.f32.mrb[6].mxu0 }
 0x582   : > { %v915_v37 = vmul.f32 0.0625, %v911_v36  ;;  %v1195_v38 = vpop.f32.mrb[7].mxu0 }
 0x584   : > { %v916_v39 = vmul.f32 %v915_v37, %v915_v37  ;;  %v925_v45 = vsub.f32 %v723_v15, %v915_v37 }
 0x586   : > { %v918_v40 = vrot.slane %v916_v39, 7 }
 0x588   : > { %v920_v1 = vsub.f32 %v915_v37, %v918_v40 }
 0x58a   : > { %v921_v41 = vmax.f32 %v920_v1, 0.0 }
 0x58c   : > { %v922_v42 = vadd.f32 1e-05, %v921_v41 }
 0x58e   : > { %1294 = vrsqrt.f32 %v922_v42 }
 0x598   : > { %v1295_v43 = vpop.eup %1294 }
 0x599   : > { %v924_v44 = vmul.f32 %v1295_v43, %v723_v15 }
 0x59b   : > { %v927_v46 = vrot.slane %v924_v44, 1  ;;  %v937_v47 = vrot.slane %v924_v44, %v650_v13 }
 0x59d   : > { %v929_v48 = vmul.f32 %v927_v46, %v925_v45  ;;  %v938_v49 = vmul.f32 %v937_v47, %v716_v61  ;;  %v939_v50 = vmul.f32 %v937_v47, %v719_v63 }
 0x59f   : > { %v931_v51 = vrot.slane %v929_v48, 6  ;;  %v940_v53 = vadd.f32 %v938_v49, %v1504_v9  ;;  %v941_v54 = vadd.f32 %v939_v50, %v1506_v10 }
 0x5a1   : > { %v933_v52 = vadd.f32 %v931_v51, %v723_v15 }
 0x5a3   : > { %v945_v55 = vrot.slane %v933_v52, %v656_v24 }
 0x5a5   : > { %v946_v56 = vadd.f32 %v945_v55, %v940_v53  ;;  %v947_v57 = vadd.f32 %v945_v55, %v941_v54 }
 0x5a7   : > { %v948_v9 = vmax.f32 %v946_v56, 0.0  ;;  %v949_v10 = vmax.f32 %v947_v57, 0.0 }
 0x5a9   : > { %950 = vst [vmem:[%s325_s25] sm:$0xff] %v948_v9  ;;  %951 = vst [vmem:[%s325_s25 + $0x8] sm:$0xff] %v949_v10 }
 0x5aa   : > { %1309 = shalt.err (!%p1306_p3)
}
 0x5ab   : > { %s1310_s22 = scalar_lea.hbm %s1672_s29, 256  ;;  %s1314_s25 = scalar_lea.hbm %s1726_s9, 512 }
 0x5ac   : > { %p1311_p4 = scmp.ne.s32.totalorder %s1672_s29, %s1310_s22  ;;  %p1315_p9 = scmp.lt.u32.totalorder %s1672_s29, %s1726_s9 }
 0x5ad   : > { %p1316_p10 = scmp.lt.u32.totalorder %s1314_s25, %s1310_s22  ;;  %p1318_p12 = scmp.lt.u32.totalorder %s1310_s22, %s1672_s29 }
 0x5ae   : > { %p1312_p7 = pnand %p1311_p4, %p1454_p5 }
 0x5af   : > { %p1317_p11 = por %p1316_p10, %p1315_p9 }
 0x5b0   : > { %p1313_p8 = pneg %p1312_p7 }
 0x5b1   : > { %p1319_p13 = por %p1318_p12, %p1317_p11 }
 0x5b3   : > { %p1320_p0 = pnand %p1319_p13, %p1313_p8 }
 0x5b5   : > { %1323 = shalt.err (!%p1320_p0)
}
 0x5b6   : > { %s1364_s13 = smov 128   ;;  %s1365_s16 = smov 8  }
 0x5b7   : > { %1238 = dma.vmem_to_hbm [thread:$0]  (%p1454_p5), %s1674_s26, 256, %s1672_s29, %s1676_s14, %s1364_s13, %s1364_s13, %s1365_s16  }
 0x5b8 PF: > { %p1244_p1 = scmp.ge.s32.totalorder %s1358_s12, 2  ;;  %s981_s17 = sand.u32 1, %s1346_s30  }
 0x5b9   : > { %s982_s21 = scalar_lea.sflag [#allocation3], %s981_s17 }
 0x5ba   : > { %p1241_p2 = pnand %p1244_p1, %p1458_p6 }
 0x5bc   : > { %1341 = dma.done.wait (!%p1241_p2), %s982_s21, 256  }
 0x5bd   : > { %1343 = vsyncadd (!%p1241_p2), %s982_s21, 4294967040  ;;  %p19_p3 = scmp.ge.s32.totalorder %s1441_s15, 4   ;;  %s1729_s30 = smov %s1350_s10 }
 0x5be   : > { %s1730_s10 = smov %s1354_s11  ;;  %s1731_s11 = smov %s1452_s18 }
 0x5bf   : > { %s1732_s12 = smov %s1441_s15  ;;  %21 = sbr.rel (!%p19_p3) target bundleno = 3 (0x3), region = 91 }
 0x5c6   :  { %987 = vsyncpa [#allocation3], 1 }
 0x5c7   :  { %989 = vsyncpa [#allocation3 + $0x1], 1 }

</bundles_post_ra>
